<compile_context>
chip_gen: v7x
topology: tpu7x:2x2x1
jax: 0.10.0
libtpu: 0.0.40
codegen_flags: <defaults>
</compile_context>

<pallas_src>
import functools

import jax
import jax.numpy as jnp
from jax import lax
from jax.experimental import pallas as pl
from jax.experimental.pallas import tpu as pltpu

_INV_SQRT2 = 0.7071067811865476


def _erf(z):
    # Abramowitz & Stegun 7.1.26 rational approximation, |err| < 1.5e-7
    # (float32-level accuracy). torch.nn.GELU() is the exact erf-based GELU;
    # this evaluates erf with EUP-friendly ops (exp) plus a short polynomial,
    # and it is only applied to the small (B, TI, C) gate tensor per tile.
    a1, a2, a3, a4, a5 = (0.254829592, -0.284496736, 1.421413741,
                          -1.453152027, 1.061405429)
    p = 0.3275911
    za = jnp.abs(z)
    t = 1.0 / (1.0 + p * za)
    poly = ((((a5 * t + a4) * t + a3) * t + a2) * t + a1) * t
    y = 1.0 - poly * jnp.exp(-za * za)
    return jnp.where(z < 0, -y, y)


def _gelu_exact(z):
    return 0.5 * z * (1.0 + _erf(z * _INV_SQRT2))


def _norm_se3_kernel(xp_ref, xn_ref, scale_ref, o_ref, *, eps):
    f32 = jnp.float32
    xp = xp_ref[...].astype(f32)        # (TI, N, C): batches of this tile, all nodes
    xn = xn_ref[...].astype(f32)        # (B, TI, C): all batches, nodes of this tile
    scale = scale_ref[...].astype(f32)  # (1, 1, C)

    # ---- gate: g[b, d] = mean_a GELU(max(||x[a, b, :]||, eps) * scale[d]) ----
    # Only this tile's slice of g is needed; computed from the (B, TI, C) view,
    # so the total GELU work across the whole grid is exactly B*N*C.
    ssn = jnp.sum(xn * xn, axis=-1, keepdims=True)           # (B, TI, 1)
    nrm = jnp.maximum(jnp.sqrt(ssn), eps)                     # torch .clamp(min=eps)
    g = jnp.mean(_gelu_exact(nrm * scale), axis=0)            # (TI, C)

    # ---- phase: x / max(||x||, eps), via rsqrt on the EUP (clamp folded in) ----
    ssp = jnp.sum(xp * xp, axis=-1, keepdims=True)            # (TI, N, 1)
    inv = jnp.where(ssp > eps * eps, lax.rsqrt(ssp), 1.0 / eps)
    phase = xp * inv                                          # (TI, N, C)

    # out[b, c, d] = g[b, d] * phase[b, c, d]
    o_ref[...] = (g[:, None, :] * phase).astype(o_ref.dtype)  # (TI, N, C)


def _pick_tile(N, C, itemsize, vmem_budget_bytes):
    """Largest leading-axis tile whose double-buffered, lane-padded blocks
    (x-phase view + x-norm view + output) fit the VMEM budget."""
    c_pad = -(-C // 128) * 128                  # minor dim is lane-padded in VMEM
    per_row = 3 * N * c_pad * itemsize          # bytes per tile-row across 3 blocks
    ti = max(1, vmem_budget_bytes // (2 * per_row))   # /2: double buffering
    if ti >= N or N <= 8:
        return N
    return max(8, (min(ti, N) // 8) * 8)        # keep second-minor 8-aligned


def norm_se3_forward(x, scale, *, eps=1e-12, tile=None,
                     vmem_budget_bytes=24 * 1024 * 1024):
    B, N, C = x.shape
    if B != N:
        raise ValueError("NormSE3's broadcasting only type-checks when B == N")
    itemsize = jnp.dtype(x.dtype).itemsize
    if tile is None:
        tile = _pick_tile(N, C, itemsize, vmem_budget_bytes)
    tile = int(min(tile, N))
    grid = (pl.cdiv(N, tile),)

    kernel = functools.partial(_norm_se3_kernel, eps=eps)

    # Advisory cost: one mul per output element + gelu/norm over (B, N, C),
    # dominated by the O(N^2*C) HBM writeback.
    cost = pl.CostEstimate(
        flops=2 * N * N * C + 30 * B * N * C,
        transcendentals=B * N * C + 2 * B * N,
        bytes_accessed=(2 * B * N * C + N * N * C + C) * itemsize,
    )

    return pl.pallas_call(
        kernel,
        out_shape=jax.ShapeDtypeStruct((N, N, C), x.dtype),
        grid_spec=pltpu.PrefetchScalarGridSpec(
            num_scalar_prefetch=0,
            grid=grid,
            in_specs=[
                # phase view: batches of this tile, all nodes
                pl.BlockSpec((tile, N, C), lambda i: (i, 0, 0)),
                # gate/norm view: all batches, nodes of this tile
                pl.BlockSpec((B, tile, C), lambda i: (0, i, 0)),
                pl.BlockSpec((1, 1, C), lambda i: (0, 0, 0)),
            ],
            out_specs=pl.BlockSpec((tile, N, C), lambda i: (i, 0, 0)),
        ),
        compiler_params=pltpu.CompilerParams(
            dimension_semantics=("parallel",)),
        cost_estimate=cost,
    )(x, x, scale)


def _reference(x, scale, eps=1e-12):
    # Pure-JAX transcription of the PyTorch forward (identical broadcasting).
    nrm = jnp.maximum(jnp.linalg.norm(x, axis=-1, keepdims=True), eps)  # (B,N,1)
    phase = x / nrm                                                     # (B,N,C)
    transformed = nrm[..., None]                                        # (B,N,1,1)
    transformed = jax.nn.gelu(transformed * scale, approximate=False)   # (B,N,1,C)
    # .squeeze(-1) in the PyTorch code is a no-op since C != 1
    output = transformed * phase                                        # (B,N,N,C)
    return jnp.mean(output, axis=0)                                     # (N,N,C)


if __name__ == "__main__":
    B = N = 8       # module broadcasting requires batch == nodes
    C = 32          # input_dim
    key = jax.random.PRNGKey(0)
    kx, ks = jax.random.split(key)
    x = jax.random.normal(kx, (B, N, C), dtype=jnp.float32)

    # Parameter per NormSE3.__init__ (gated_scale=False): scale has shape
    # (1, 1, input_dim); perturb it slightly so the per-channel broadcast is
    # actually exercised by the check.
    scale = 1.0 + 0.05 * jax.random.normal(ks, (1, 1, C), dtype=jnp.float32)

    out = jax.block_until_ready(norm_se3_forward(x, scale))

    ref = _reference(x, scale)
    assert out.shape == (N, N, C), out.shape
    if not jnp.allclose(out, ref, atol=1e-5, rtol=1e-5):
        raise AssertionError(
            f"mismatch vs reference, max abs err {jnp.max(jnp.abs(out - ref))}")
    print("KERNEL_OK")
</pallas_src>

<mosaic_0001>
module attributes {stable_mosaic.version = 11 : i64} {
  func.func @_norm_se3_kernel(%arg0: i32, %arg1: memref<8x8x32xf32, #tpu.memory_space<vmem>>, %arg2: memref<8x8x32xf32, #tpu.memory_space<vmem>>, %arg3: memref<1x1x32xf32, #tpu.memory_space<vmem>>, %arg4: memref<8x8x32xf32, #tpu.memory_space<vmem>>) attributes {dimension_semantics = [#tpu.dimension_semantics<parallel>], iteration_bounds = array<i64: 1>, scalar_prefetch = 0 : i64, scratch_operands = 0 : i64, tpu.core_type = #tpu.core_type<tc>, window_params = [{transform_indices = @transform_0, window_bounds = array<i64: 8, 8, 32>}, {transform_indices = @transform_1, window_bounds = array<i64: 8, 8, 32>}, {pipeline_mode = #tpu.pipeline_mode<synchronous>, transform_indices = @transform_2, window_bounds = array<i64: 1, 1, 32>}, {transform_indices = @transform_3, window_bounds = array<i64: 8, 8, 32>}]} {
    %c0 = arith.constant 0 : index
    %c0_0 = arith.constant 0 : index
    %c0_1 = arith.constant 0 : index
    %0 = vector.load %arg1[%c0, %c0_0, %c0_1] : memref<8x8x32xf32, #tpu.memory_space<vmem>>, vector<8x8x32xf32>
    %c0_2 = arith.constant 0 : index
    %c0_3 = arith.constant 0 : index
    %c0_4 = arith.constant 0 : index
    %1 = vector.load %arg2[%c0_2, %c0_3, %c0_4] : memref<8x8x32xf32, #tpu.memory_space<vmem>>, vector<8x8x32xf32>
    %c0_5 = arith.constant 0 : index
    %c0_6 = arith.constant 0 : index
    %c0_7 = arith.constant 0 : index
    %2 = vector.load %arg3[%c0_5, %c0_6, %c0_7] : memref<1x1x32xf32, #tpu.memory_space<vmem>>, vector<1x1x32xf32>
    %3 = arith.mulf %1, %1 : vector<8x8x32xf32>
    %cst = arith.constant dense<0.000000e+00> : vector<8x8xf32>
    %4 = vector.multi_reduction <add>, %3, %cst [2] : vector<8x8x32xf32> to vector<8x8xf32>
    %5 = vector.shape_cast %4 : vector<8x8xf32> to vector<8x8x1xf32>
    %6 = math.sqrt %5 : vector<8x8x1xf32>
    %cst_8 = arith.constant 9.99999996E-13 : f32
    %7 = vector.broadcast %cst_8 : f32 to vector<8x8x1xf32>
    %8 = arith.maximumf %6, %7 : vector<8x8x1xf32>
    %9 = vector.broadcast %8 : vector<8x8x1xf32> to vector<8x8x32xf32>
    %10 = vector.broadcast %2 : vector<1x1x32xf32> to vector<8x8x32xf32>
    %11 = arith.mulf %9, %10 : vector<8x8x32xf32>
    %cst_9 = arith.constant 5.000000e-01 : f32
    %12 = vector.broadcast %cst_9 : f32 to vector<8x8x32xf32>
    %13 = arith.mulf %12, %11 : vector<8x8x32xf32>
    %cst_10 = arith.constant 0.707106769 : f32
    %14 = vector.broadcast %cst_10 : f32 to vector<8x8x32xf32>
    %15 = arith.mulf %11, %14 : vector<8x8x32xf32>
    %16 = math.absf %15 : vector<8x8x32xf32>
    %cst_11 = arith.constant 0.327591091 : f32
    %17 = vector.broadcast %cst_11 : f32 to vector<8x8x32xf32>
    %18 = arith.mulf %17, %16 : vector<8x8x32xf32>
    %cst_12 = arith.constant 1.000000e+00 : f32
    %19 = vector.broadcast %cst_12 : f32 to vector<8x8x32xf32>
    %20 = arith.addf %19, %18 : vector<8x8x32xf32>
    %cst_13 = arith.constant 1.000000e+00 : f32
    %21 = vector.broadcast %cst_13 : f32 to vector<8x8x32xf32>
    %22 = arith.divf %21, %20 : vector<8x8x32xf32>
    %cst_14 = arith.constant 1.06140542 : f32
    %23 = vector.broadcast %cst_14 : f32 to vector<8x8x32xf32>
    %24 = arith.mulf %23, %22 : vector<8x8x32xf32>
    %cst_15 = arith.constant -1.45315206 : f32
    %25 = vector.broadcast %cst_15 : f32 to vector<8x8x32xf32>
    %26 = arith.addf %24, %25 : vector<8x8x32xf32>
    %27 = arith.mulf %26, %22 : vector<8x8x32xf32>
    %cst_16 = arith.constant 1.42141378 : f32
    %28 = vector.broadcast %cst_16 : f32 to vector<8x8x32xf32>
    %29 = arith.addf %27, %28 : vector<8x8x32xf32>
    %30 = arith.mulf %29, %22 : vector<8x8x32xf32>
    %cst_17 = arith.constant -0.284496725 : f32
    %31 = vector.broadcast %cst_17 : f32 to vector<8x8x32xf32>
    %32 = arith.addf %30, %31 : vector<8x8x32xf32>
    %33 = arith.mulf %32, %22 : vector<8x8x32xf32>
    %cst_18 = arith.constant 0.254829586 : f32
    %34 = vector.broadcast %cst_18 : f32 to vector<8x8x32xf32>
    %35 = arith.addf %33, %34 : vector<8x8x32xf32>
    %36 = arith.mulf %35, %22 : vector<8x8x32xf32>
    %cst_19 = arith.constant 0.000000e+00 : f32
    %37 = vector.broadcast %cst_19 : f32 to vector<8x8x32xf32>
    %38 = arith.subf %37, %16 : vector<8x8x32xf32>
    %39 = arith.mulf %38, %16 : vector<8x8x32xf32>
    %40 = math.exp %39 : vector<8x8x32xf32>
    %41 = arith.mulf %36, %40 : vector<8x8x32xf32>
    %cst_20 = arith.constant 1.000000e+00 : f32
    %42 = vector.broadcast %cst_20 : f32 to vector<8x8x32xf32>
    %43 = arith.subf %42, %41 : vector<8x8x32xf32>
    %cst_21 = arith.constant 0.000000e+00 : f32
    %44 = vector.broadcast %cst_21 : f32 to vector<8x8x32xf32>
    %45 = arith.cmpf olt, %15, %44 : vector<8x8x32xf32>
    %cst_22 = arith.constant 0.000000e+00 : f32
    %46 = vector.broadcast %cst_22 : f32 to vector<8x8x32xf32>
    %47 = arith.subf %46, %43 : vector<8x8x32xf32>
    %48 = arith.select %45, %47, %43 : vector<8x8x32xi1>, vector<8x8x32xf32>
    %cst_23 = arith.constant 1.000000e+00 : f32
    %49 = vector.broadcast %cst_23 : f32 to vector<8x8x32xf32>
    %50 = arith.addf %49, %48 : vector<8x8x32xf32>
    %51 = arith.mulf %13, %50 : vector<8x8x32xf32>
    %cst_24 = arith.constant dense<0.000000e+00> : vector<8x32xf32>
    %52 = vector.multi_reduction <add>, %51, %cst_24 [0] : vector<8x8x32xf32> to vector<8x32xf32>
    %cst_25 = arith.constant 8.000000e+00 : f32
    %53 = vector.broadcast %cst_25 : f32 to vector<8x32xf32>
    %54 = arith.divf %52, %53 : vector<8x32xf32>
    %55 = arith.mulf %0, %0 : vector<8x8x32xf32>
    %cst_26 = arith.constant dense<0.000000e+00> : vector<8x8xf32>
    %56 = vector.multi_reduction <add>, %55, %cst_26 [2] : vector<8x8x32xf32> to vector<8x8xf32>
    %57 = vector.shape_cast %56 : vector<8x8xf32> to vector<8x8x1xf32>
    %cst_27 = arith.constant 1.000000e-24 : f32
    %58 = vector.broadcast %cst_27 : f32 to vector<8x8x1xf32>
    %59 = arith.cmpf ogt, %57, %58 : vector<8x8x1xf32>
    %60 = math.rsqrt %57 : vector<8x8x1xf32>
    %cst_28 = arith.constant 9.99999995E+11 : f32
    %61 = vector.broadcast %cst_28 : f32 to vector<8x8x1xf32>
    %62 = arith.select %59, %60, %61 : vector<8x8x1xi1>, vector<8x8x1xf32>
    %63 = vector.broadcast %62 : vector<8x8x1xf32> to vector<8x8x32xf32>
    %64 = arith.mulf %0, %63 : vector<8x8x32xf32>
    %65 = vector.shape_cast %54 : vector<8x32xf32> to vector<8x1x32xf32>
    %66 = vector.broadcast %65 : vector<8x1x32xf32> to vector<8x8x32xf32>
    %67 = arith.mulf %66, %64 : vector<8x8x32xf32>
    %c0_29 = arith.constant 0 : index
    %c0_30 = arith.constant 0 : index
    %c0_31 = arith.constant 0 : index
    %68 = vector.load %arg4[%c0_29, %c0_30, %c0_31] : memref<8x8x32xf32, #tpu.memory_space<vmem>>, vector<8x8x32xf32>
    tpu.vector_store %arg4[%c0_29, %c0_30, %c0_31], %67 {strides = array<i32>} : memref<8x8x32xf32, #tpu.memory_space<vmem>>, vector<8x8x32xf32>,
    return
  }
  func.func @transform_0(%arg0: i32) -> (i32, i32, i32) {
    %c0_i32 = arith.constant 0 : i32
    %c0_i32_0 = arith.constant 0 : i32
    %c0_i32_1 = arith.constant 0 : i32
    return %arg0, %c0_i32, %c0_i32_0 : i32, i32, i32
  }
  func.func @transform_1(%arg0: i32) -> (i32, i32, i32) {
    %c0_i32 = arith.constant 0 : i32
    %c0_i32_0 = arith.constant 0 : i32
    %c0_i32_1 = arith.constant 0 : i32
    return %c0_i32, %arg0, %c0_i32_0 : i32, i32, i32
  }
  func.func @transform_2(%arg0: i32) -> (i32, i32, i32) {
    %c0_i32 = arith.constant 0 : i32
    %c0_i32_0 = arith.constant 0 : i32
    %c0_i32_1 = arith.constant 0 : i32
    %c0_i32_2 = arith.constant 0 : i32
    return %c0_i32, %c0_i32_0, %c0_i32_1 : i32, i32, i32
  }
  func.func @transform_3(%arg0: i32) -> (i32, i32, i32) {
    %c0_i32 = arith.constant 0 : i32
    %c0_i32_0 = arith.constant 0 : i32
    %c0_i32_1 = arith.constant 0 : i32
    return %arg0, %c0_i32, %c0_i32_0 : i32, i32, i32
  }
}

</mosaic_0001>

<bundles_post_ra>
// kernel: tpu_custom_call.1
= control target key start
LH: loop header
LB: loop body
LE: loop exit
PB: predicated region body
PF: predicated region fallthrough
CT: control target
= control target key end

     0   :  { %8 = vsyncpa [#allocation3], 0  ;;  %s1085_s0 = inlined_call_operand.hbm [shape: f32[8,8,32], index: 0, kind: input, shape index: {}]   ;;  %s1086_s1 = inlined_call_operand.hbm [shape: f32[8,8,32], index: 1, kind: input, shape index: {}]   ;;  %s1087_s2 = inlined_call_operand.vmem [shape: f32[1,1,32], index: 2, kind: input, shape index: {}]   ;;  %s1088_s3 = inlined_call_operand.hbm [shape: f32[8,8,32], index: 3, kind: output, shape index: {}]  }
   0x1   :  { %9 = vsyncpa [#allocation6], 0 }
   0x2   :  { %10 = vsyncpa [#allocation4], 0  ;;  %s735_s12 = smov [#allocation2]   ;;  %s663_s16 = scalar_lea.hbm %s1085_s0, 1024 }
   0x3   :  { %s16_s13 = sshll.u32 %s735_s12, 4  ;;  %p664_p0 = scmp.ne.s32.totalorder %s1085_s0, %s663_s16  ;;  %s17_s13 = int_to_ptr.vmem [resolvable:$true] %s16_s13 }
   0x4   :  { %p667_p1 = scmp.lt.u32.totalorder %s663_s16, %s1085_s0 }
   0x6   :  { %p669_p2 = pnand %p667_p1, %p664_p0 }
   0x8   :  { %672 = shalt.err (!%p669_p2)
}
   0x9   :  { %s673_s21 = scalar_lea.vmem %s17_s13, 1024  ;;  %p678_p4 = scmp.lt.s32.totalorder %s17_s13, %s17_s13 }
   0xa   :  { %p674_p3 = scmp.ne.s32.totalorder %s17_s13, %s673_s21  ;;  %p679_p5 = scmp.lt.s32.totalorder %s673_s21, %s673_s21 }
   0xc   :  { %p680_p6 = por %p679_p5, %p678_p4 }
   0xe   :  { %p681_p7 = pnand %p680_p6, %p674_p3 }
  0x10   :  { %684 = shalt.err (!%p681_p7)
}
  0x11   :  { %s736_s22 = smov 128   ;;  %s737_s23 = smov 8  }
  0x12   :  { %22 = dma.hbm_to_vmem [thread:$0]  %s1085_s0, 1024, %s17_s13, [#allocation3], %s736_s22, %s736_s22, %s737_s23  }
  0x13   :  { %s738_s26 = smov [#allocation5]   ;;  %s685_s30 = scalar_lea.hbm %s1086_s1, 1024 }
  0x14   :  { %s28_s27 = sshll.u32 %s738_s26, 4  ;;  %p686_p8 = scmp.ne.s32.totalorder %s1086_s1, %s685_s30  ;;  %s29_s27 = int_to_ptr.vmem [resolvable:$true] %s28_s27 }
  0x15   :  { %p689_p9 = scmp.lt.u32.totalorder %s685_s30, %s1086_s1 }
  0x17   :  { %p691_p10 = pnand %p689_p9, %p686_p8 }
  0x19   :  { %694 = shalt.err (!%p691_p10)
}
  0x1a   :  { %s695_s8 = scalar_lea.vmem %s29_s27, 1024  ;;  %p700_p12 = scmp.lt.s32.totalorder %s29_s27, %s29_s27 }
  0x1b   :  { %p696_p11 = scmp.ne.s32.totalorder %s29_s27, %s695_s8  ;;  %p701_p13 = scmp.lt.s32.totalorder %s695_s8, %s695_s8 }
  0x1d   :  { %p702_p0 = por %p701_p13, %p700_p12 }
  0x1f   :  { %p703_p1 = pnand %p702_p0, %p696_p11 }
  0x21   :  { %706 = shalt.err (!%p703_p1)
}
  0x22   :  { %34 = dma.hbm_to_vmem [thread:$0]  %s1086_s1, 1024, %s29_s27, [#allocation6], %s736_s22, %s736_s22, %s737_s23  }
  0x23   :  { %729 = dma.done.wait [#allocation3], 1024  }
  0x24   :  { %730 = vsyncadd [#allocation3], 4294966272 }
  0x25   :  { %731 = dma.done.wait [#allocation6], 1024  }
  0x26   :  { %732 = vsyncadd [#allocation6], 4294966272  ;;  %v53_v0 = vld [vmem:[#allocation5 + $0x10] sm:$0xff]  ;;  %vm68_vm0 = vcmask 261120   ;;  %v51_v1 = vld [vmem:[#allocation5] sm:$0xff] }
  0x27   :  { %v54_v2 = vld [vmem:[#allocation5 + $0x18] sm:$0xff]  ;;  %v62_v3 = vmul.f32 %v53_v0, %v53_v0  ;;  %v60_v4 = vmul.f32 %v51_v1, %v51_v1  ;;  %v52_v6 = vld [vmem:[#allocation5 + $0x8] sm:$0xff]  ;;  %v55_v9 = vld [vmem:[#allocation5 + $0x20] sm:$0xff] }
  0x28   :  { %v63_v5 = vmul.f32 %v54_v2, %v54_v2  ;;  %v61_v7 = vmul.f32 %v52_v6, %v52_v6  ;;  %v56_v8 = vld [vmem:[#allocation5 + $0x28] sm:$0xff]  ;;  %v64_v15 = vmul.f32 %v55_v9, %v55_v9  ;;  %v58_v16 = vld [vmem:[#allocation5 + $0x38] sm:$0xff]  ;;  %v57_v17 = vld [vmem:[#allocation5 + $0x30] sm:$0xff] }
  0x29   :  { %v75_v10 = vsel %vm68_vm0, %v62_v3, 0.0  ;;  %v69_v11 = vsel %vm68_vm0, %v60_v4, 0.0  ;;  %v65_v14 = vmul.f32 %v56_v8, %v56_v8  ;;  %v67_v20 = vmul.f32 %v58_v16, %v58_v16  ;;  %v797_v22 = vld [vmem:[#allocation2 + $0x8] sm:$0xff]  ;;  %v799_v23 = vld [vmem:[#allocation2] sm:$0xff]  ;;  %v807_v28 = vld [vmem:[#allocation2 + $0x18] sm:$0xff] }
  0x2a   :  { %76 = vadd.xlane.f32.xlu1 %v75_v10  ;;  %70 = vadd.xlane.f32.xlu0 %v69_v11  ;;  %v78_v12 = vsel %vm68_vm0, %v63_v5, 0.0  ;;  %v72_v13 = vsel %vm68_vm0, %v61_v7, 0.0  ;;  %v81_v19 = vsel %vm68_vm0, %v64_v15, 0.0  ;;  %v66_v21 = vmul.f32 %v57_v17, %v57_v17  ;;  %v809_v29 = vld [vmem:[#allocation2 + $0x10] sm:$0xff]  ;;  %v817_v34 = vld [vmem:[#allocation2 + $0x28] sm:$0xff]  ;;  %v819_v35 = vld [vmem:[#allocation2 + $0x20] sm:$0xff] }
  0x2b   :  { %v84_v18 = vsel %vm68_vm0, %v65_v14, 0.0  ;;  %v90_v24 = vsel %vm68_vm0, %v67_v20, 0.0  ;;  %v405_v26 = vmul.f32 %v797_v22, %v797_v22  ;;  %v404_v27 = vmul.f32 %v799_v23, %v799_v23  ;;  %v827_v40 = vld [vmem:[#allocation2 + $0x38] sm:$0xff]  ;;  %v829_v41 = vld [vmem:[#allocation2 + $0x30] sm:$0xff]  ;;  %v847_v62 = vld [vmem:[%s1087_s2] ss:$0 sm:$0xff] }
  0x2c   :  { %v87_v25 = vsel %vm68_vm0, %v66_v21, 0.0  ;;  %v407_v32 = vmul.f32 %v807_v28, %v807_v28  ;;  %v406_v33 = vmul.f32 %v809_v29, %v809_v29  ;;  %v409_v38 = vmul.f32 %v817_v34, %v817_v34  ;;  %s740_s2 = smov [#allocation7]  }
  0x2d   :  { %v415_v30 = vsel %vm68_vm0, %v405_v26, 0.0  ;;  %v412_v31 = vsel %vm68_vm0, %v404_v27, 0.0  ;;  %v408_v39 = vmul.f32 %v819_v35, %v819_v35  ;;  %v411_v44 = vmul.f32 %v827_v40, %v827_v40  ;;  %s579_s11 = sshll.u32 %s740_s2, 4  ;;  %s580_s11 = int_to_ptr.vmem [resolvable:$true] %s579_s11 }
  0x2e   :  { %79 = vadd.xlane.f32.xlu1 %v78_v12  ;;  %73 = vadd.xlane.f32.xlu0 %v72_v13  ;;  %v421_v36 = vsel %vm68_vm0, %v407_v32, 0.0  ;;  %v418_v37 = vsel %vm68_vm0, %v406_v33, 0.0  ;;  %v427_v42 = vsel %vm68_vm0, %v409_v38, 0.0  ;;  %v410_v45 = vmul.f32 %v829_v41, %v829_v41  ;;  %s707_s12 = scalar_lea.vmem %s580_s11, 1024  ;;  %p712_p3 = scmp.lt.s32.totalorder %s580_s11, %s580_s11 }
  0x2f   :  { %v424_v43 = vsel %vm68_vm0, %v408_v39, 0.0  ;;  %v433_v46 = vsel %vm68_vm0, %v411_v44, 0.0  ;;  %p708_p2 = scmp.ne.s32.totalorder %s580_s11, %s707_s12  ;;  %p713_p4 = scmp.lt.s32.totalorder %s707_s12, %s707_s12 }
  0x30   :  { %v430_v47 = vsel %vm68_vm0, %v410_v45, 0.0 }
  0x31   :  { %p714_p5 = por %p713_p4, %p712_p3 }
  0x32   :  { %85 = vadd.xlane.f32.xlu1 %v84_v18  ;;  %82 = vadd.xlane.f32.xlu0 %v81_v19 }
  0x33   :  { %p715_p6 = pnand %p714_p5, %p708_p2 }
  0x36   :  { %91 = vadd.xlane.f32.xlu1 %v90_v24  ;;  %88 = vadd.xlane.f32.xlu0 %v87_v25 }
  0x3a   :  { %416 = vadd.xlane.f32.xlu1 %v415_v30  ;;  %413 = vadd.xlane.f32.xlu0 %v412_v31 }
  0x3e   :  { %422 = vadd.xlane.f32.xlu1 %v421_v36  ;;  %419 = vadd.xlane.f32.xlu0 %v418_v37 }
  0x42   :  { %428 = vadd.xlane.f32.xlu1 %v427_v42  ;;  %425 = vadd.xlane.f32.xlu0 %v424_v43 }
  0x46   :  { %434 = vadd.xlane.f32.xlu1 %v433_v46  ;;  %431 = vadd.xlane.f32.xlu0 %v430_v47 }
  0xb7   :  { %v77_v48 = vpop.xlane.xlu1 %76  ;;  %v71_v49 = vpop.xlane.xlu0 %70 }
  0xb8   :  { %599 = vrsqrt.f32 %v77_v48  ;;  %vm109_vm1 = vcmp.eq.f32.partialorder %v77_v48, inf  ;;  %vm111_vm2 = vcmp.eq.f32.partialorder %v77_v48, 0.0  ;;  %v112_v57 = vand.u32 2147483648, %v77_v48 }
  0xb9   :  { %601 = vrsqrt.f32 %v71_v49  ;;  %vm95_vm3 = vcmp.eq.f32.partialorder %v71_v49, inf  ;;  %vm97_vm4 = vcmp.eq.f32.partialorder %v71_v49, 0.0  ;;  %v98_v60 = vand.u32 2147483648, %v71_v49 }
  0xbb   :  { %v80_v50 = vpop.xlane.xlu1 %79  ;;  %v74_v51 = vpop.xlane.xlu0 %73 }
  0xbc   :  { %603 = vrsqrt.f32 %v80_v50  ;;  %vm116_vm5 = vcmp.eq.f32.partialorder %v80_v50, inf  ;;  %vm118_vm6 = vcmp.eq.f32.partialorder %v80_v50, 0.0  ;;  %v119_v7 = vand.u32 2147483648, %v80_v50 }
  0xbd   :  { %605 = vrsqrt.f32 %v74_v51  ;;  %vm102_vm7 = vcmp.eq.f32.partialorder %v74_v51, inf  ;;  %vm104_vm8 = vcmp.eq.f32.partialorder %v74_v51, 0.0  ;;  %v105_v11 = vand.u32 2147483648, %v74_v51 }
  0xbf   :  { %v839_v52 = vpop.xlane.xlu1 %85  ;;  %v842_v56 = vpop.xlane.xlu0 %82 }
  0xc0   :  { %607 = vrsqrt.f32 %v839_v52  ;;  %vm130_vm9 = vcmp.eq.f32.partialorder %v839_v52, inf  ;;  %v133_v46 = vand.u32 2147483648, %v839_v52  ;;  %vm132_vm10 = vcmp.eq.f32.partialorder %v839_v52, 0.0 }
  0xc1   :  { %609 = vrsqrt.f32 %v842_v56  ;;  %vm123_vm11 = vcmp.eq.f32.partialorder %v842_v56, inf  ;;  %vm125_vm12 = vcmp.eq.f32.partialorder %v842_v56, 0.0 }
  0xc2   :  { %v600_v53 = vpop.eup %599 }
  0xc3   :  { %v602_v54 = vpop.eup %601  ;;  %v108_v55 = vmul.f32 %v600_v53, %v77_v48  ;;  %v850_v5 = vpop.xlane.xlu1 %91 }
  0xc4   :  { %v94_v58 = vmul.f32 %v602_v54, %v71_v49  ;;  %v855_v12 = vpop.xlane.xlu0 %88  ;;  %611 = vrsqrt.f32 %v850_v5  ;;  %vm144_vm13 = vcmp.eq.f32.partialorder %v850_v5, inf  ;;  %vm146_vm14 = vcmp.eq.f32.partialorder %v850_v5, 0.0 }
  0xc5   :  { %v110_v59 = vsel %vm109_vm1, %v77_v48, %v108_v55  ;;  %613 = vrsqrt.f32 %v855_v12  ;;  %vm137_vm15 = vcmp.eq.f32.partialorder %v855_v12, inf  ;;  %vm139_vm1 = vcmp.eq.f32.partialorder %v855_v12, 0.0 }
  0xc6   :  { %v604_v61 = vpop.eup %603  ;;  %v113_v63 = vsel %vm111_vm2, %v112_v57, %v110_v59  ;;  %v96_v0 = vsel %vm95_vm3, %v71_v49, %v94_v58  ;;  %v126_v57 = vand.u32 2147483648, %v842_v56 }
  0xc7   :  { %v606_v1 = vpop.eup %605  ;;  %v151_v2 = vmax.f32 %v113_v63, 1e-12  ;;  %v99_v3 = vsel %vm97_vm4, %v98_v60, %v96_v0  ;;  %v115_v4 = vmul.f32 %v604_v61, %v80_v50 }
  0xc8   :  { %v149_v6 = vmax.f32 %v99_v3, 1e-12  ;;  %v101_v8 = vmul.f32 %v606_v1, %v74_v51 }
  0xc9   :  { %v853_v9 = vmul.f32 %v847_v62, %v151_v2  ;;  %v117_v10 = vsel %vm116_vm5, %v80_v50, %v115_v4 }
  0xca   :  { %v858_v13 = vmul.f32 %v847_v62, %v149_v6  ;;  %v120_v14 = vsel %vm118_vm6, %v119_v7, %v117_v10  ;;  %v103_v15 = vsel %vm102_vm7, %v74_v51, %v101_v8  ;;  %v608_v16 = vpop.eup %607 }
  0xcb   :  { %v862_v17 = vmul.f32 0.70710677, %v853_v9  ;;  %v152_v18 = vmax.f32 %v120_v14, 1e-12  ;;  %v106_v19 = vsel %vm104_vm8, %v105_v11, %v103_v15  ;;  %v129_v30 = vmul.f32 %v608_v16, %v839_v52  ;;  %v610_v33 = vpop.eup %609 }
  0xcc   :  { %v865_v20 = vmul.f32 0.70710677, %v858_v13  ;;  %v150_v21 = vmax.f32 %v106_v19, 1e-12  ;;  %v122_v47 = vmul.f32 %v610_v33, %v842_v56 }
  0xcd   :  { %v189_v24 = vand.u32 2147483647, %v862_v17  ;;  %v870_v25 = vmul.f32 %v847_v62, %v152_v18  ;;  %v131_v44 = vsel %vm130_vm9, %v839_v52, %v129_v30  ;;  %v147_v52 = vand.u32 2147483648, %v850_v5 }
  0xce   :  { %v187_v26 = vand.u32 2147483647, %v865_v20  ;;  %v874_v27 = vmul.f32 %v847_v62, %v150_v21  ;;  %v612_v48 = vpop.eup %611  ;;  %v134_v51 = vsel %vm132_vm10, %v133_v46, %v131_v44  ;;  %v124_v58 = vsel %vm123_vm11, %v842_v56, %v122_v47 }
  0xcf   :  { %v197_v31 = vmul.f32 0.3275911, %v189_v24  ;;  %v878_v32 = vmul.f32 0.70710677, %v870_v25  ;;  %v614_v53 = vpop.eup %613  ;;  %v154_v55 = vmax.f32 %v134_v51, 1e-12  ;;  %v143_v59 = vmul.f32 %v612_v48, %v850_v5 }
  0xd0   :  { %v195_v36 = vmul.f32 0.3275911, %v187_v26  ;;  %v881_v37 = vmul.f32 0.70710677, %v874_v27  ;;  %v301_v60 = vsub.f32 0.0, %v189_v24  ;;  %v127_v63 = vsel %vm125_vm12, %v126_v57, %v124_v58 }
  0xd1   :  { %v205_v38 = vadd.f32 1.0, %v197_v31  ;;  %v884_v39 = vand.u32 2147483647, %v878_v32  ;;  %v901_v61 = vmul.f32 %v847_v62, %v154_v55  ;;  %v153_v0 = vmax.f32 %v127_v63, 1e-12 }
  0xd2   :  { %v203_v42 = vadd.f32 1.0, %v195_v36  ;;  %v188_v43 = vand.u32 2147483647, %v881_v37  ;;  %v145_v1 = vsel %vm144_vm13, %v850_v5, %v143_v59  ;;  %v136_v2 = vmul.f32 %v614_v53, %v855_v12 }
  0xd3   :  { %615 = vrcp.f32 %v205_v38  ;;  %v198_v45 = vmul.f32 0.3275911, %v884_v39  ;;  %v299_v3 = vsub.f32 0.0, %v187_v26  ;;  %v907_v56 = vmul.f32 0.70710677, %v901_v61 }
  0xd4   :  { %617 = vrcp.f32 %v203_v42  ;;  %v196_v49 = vmul.f32 0.3275911, %v188_v43  ;;  %v148_v4 = vsel %vm146_vm14, %v147_v52, %v145_v1  ;;  %v910_v6 = vmul.f32 %v847_v62, %v153_v0 }
  0xd5   :  { %v206_v50 = vadd.f32 1.0, %v198_v45  ;;  %v156_v7 = vmax.f32 %v148_v4, 1e-12  ;;  %v309_v8 = vmul.f32 %v301_v60, %v189_v24  ;;  %v913_v10 = vand.u32 2147483647, %v907_v56 }
  0xd6   :  { %v204_v54 = vadd.f32 1.0, %v196_v49  ;;  %v300_v5 = vsub.f32 0.0, %v188_v43  ;;  %v919_v14 = vmul.f32 0.70710677, %v910_v6  ;;  %v138_v16 = vsel %vm137_vm15, %v855_v12, %v136_v2 }
  0xd7   :  { %619 = vrcp.f32 %v206_v50  ;;  %v922_v15 = vmul.f32 %v847_v62, %v156_v7  ;;  %v307_v21 = vmul.f32 %v299_v3, %v187_v26  ;;  %v200_v24 = vmul.f32 0.3275911, %v913_v10 }
  0xd8   :  { %621 = vrcp.f32 %v204_v54  ;;  %v140_v30 = vand.u32 2147483648, %v855_v12  ;;  %v302_v33 = vsub.f32 0.0, %v884_v39  ;;  %v933_v36 = vand.u32 2147483647, %v919_v14 }
  0xd9   :  { %v208_v42 = vadd.f32 1.0, %v200_v24  ;;  %v937_v44 = vmul.f32 0.70710677, %v922_v15  ;;  %v319_v46 = vmul.f32 1.442695, %v309_v8  ;;  %v308_v48 = vmul.f32 %v300_v5, %v188_v43 }
  0xda   :  { %v141_v45 = vsel %vm139_vm1, %v140_v30, %v138_v16  ;;  %v199_v49 = vmul.f32 0.3275911, %v933_v36  ;;  %v315_v53 = vmul.f32 1.442695, %v307_v21  ;;  %v310_v43 = vmul.f32 %v302_v33, %v884_v39 }
  0xdb   :  { %623 = vrcp.f32 %v208_v42  ;;  %v155_v58 = vmax.f32 %v141_v45, 1e-12  ;;  %v950_v60 = vand.u32 2147483647, %v937_v44  ;;  %v317_v1 = vmul.f32 1.442695, %v308_v48 }
  0xdc   :  { %v207_v57 = vadd.f32 1.0, %v199_v49  ;;  %v321_v24 = vmul.f32 1.442695, %v310_v43  ;;  %v303_v45 = vsub.f32 0.0, %v933_v36  ;;  %vm348_vm2 = vcmp.lt.f32.partialorder %v881_v37, 0.0 }
  0xdd   :  { %v916_v11 = vpop.eup %615  ;;  %v202_v4 = vmul.f32 0.3275911, %v950_v60  ;;  %v958_v39 = vmul.f32 %v847_v62, %v155_v58  ;;  %vm347_vm3 = vcmp.lt.f32.partialorder %v865_v20, 0.0  ;;  %vm349_vm4 = vcmp.lt.f32.partialorder %v862_v17, 0.0 }
  0xde   :  { %v925_v18 = vpop.eup %617  ;;  %v229_v19 = vmul.f32 1.0614054, %v916_v11  ;;  %625 = vrcp.f32 %v207_v57  ;;  %vm350_vm5 = vcmp.lt.f32.partialorder %v878_v32, 0.0  ;;  %vm351_vm6 = vcmp.lt.f32.partialorder %v919_v14, 0.0 }
  0xdf   :  { %v227_v31 = vmul.f32 1.0614054, %v925_v18  ;;  %627 = vpow2.f32 %v315_v53  ;;  %vm352_vm7 = vcmp.lt.f32.partialorder %v907_v56, 0.0  ;;  %vm354_vm8 = vcmp.lt.f32.partialorder %v937_v44, 0.0 }
  0xe0   :  { %v237_v38 = vadd.f32 -1.4531521, %v229_v19  ;;  %629 = vpow2.f32 %v319_v46  ;;  %v210_v19 = vadd.f32 1.0, %v202_v4  ;;  %v967_v46 = vmul.f32 0.70710677, %v958_v39 }
  0xe1   :  { %v939_v26 = vpop.eup %619  ;;  %v235_v47 = vadd.f32 -1.4531521, %v227_v31  ;;  %631 = vpow2.f32 %v317_v1  ;;  %v739_v44 = vmov 1966171168  }
  0xe2   :  { %v942_v50 = vpop.eup %621  ;;  %v245_v51 = vmul.f32 %v916_v11, %v237_v38  ;;  %v230_v12 = vmul.f32 1.0614054, %v939_v26  ;;  %v304_v38 = vsub.f32 0.0, %v913_v10  ;;  %633 = vrcp.f32 %v210_v19 }
  0xe3   :  { %v243_v54 = vmul.f32 %v925_v18, %v235_v47  ;;  %v228_v55 = vmul.f32 1.0614054, %v942_v50  ;;  %635 = vpow2.f32 %v321_v24  ;;  %v193_v57 = vand.u32 2147483647, %v967_v46 }
  0xe4   :  { %v253_v59 = vadd.f32 1.4214138, %v245_v51  ;;  %v238_v52 = vadd.f32 -1.4531521, %v230_v12  ;;  %vm353_vm9 = vcmp.lt.f32.partialorder %v967_v46, 0.0 }
  0xe5   :  { %v251_v63 = vadd.f32 1.4214138, %v243_v54  ;;  %v236_v0 = vadd.f32 -1.4531521, %v228_v55  ;;  %v969_v47 = vpop.eup %623  ;;  %v312_v55 = vmul.f32 %v304_v38, %v913_v10  ;;  %v201_v4 = vmul.f32 0.3275911, %v193_v57 }
  0xe6   :  { %v261_v2 = vmul.f32 %v916_v11, %v253_v59  ;;  %v246_v3 = vmul.f32 %v939_v26, %v238_v52  ;;  %v232_v12 = vmul.f32 1.0614054, %v969_v47 }
  0xe7   :  { %v259_v7 = vmul.f32 %v925_v18, %v251_v63  ;;  %v244_v8 = vmul.f32 %v942_v50, %v236_v0  ;;  %v311_v63 = vmul.f32 %v303_v45, %v933_v36 }
  0xe8   :  { %v269_v5 = vadd.f32 -0.28449672, %v261_v2  ;;  %v254_v16 = vadd.f32 1.4214138, %v246_v3  ;;  %v975_v58 = vpop.eup %625  ;;  %v240_v43 = vadd.f32 -1.4531521, %v232_v12 }
  0xe9   :  { %v267_v21 = vadd.f32 -0.28449672, %v259_v7  ;;  %v252_v30 = vadd.f32 1.4214138, %v244_v8  ;;  %v628_v0 = vpop.eup %627  ;;  %v231_v3 = vmul.f32 1.0614054, %v975_v58 }
  0xea   :  { %v277_v31 = vmul.f32 %v916_v11, %v269_v5  ;;  %v262_v33 = vmul.f32 %v939_v26, %v254_v16  ;;  %v248_v8 = vmul.f32 %v969_v47, %v240_v43  ;;  %v630_v5 = vpop.eup %629  ;;  %v325_v16 = vmul.f32 1.442695, %v312_v55 }
  0xeb   :  { %v275_v42 = vmul.f32 %v925_v18, %v267_v21  ;;  %v260_v62 = vmul.f32 %v942_v50, %v252_v30  ;;  %v239_v19 = vadd.f32 -1.4531521, %v231_v3  ;;  %v632_v21 = vpop.eup %631  ;;  %v323_v36 = vmul.f32 1.442695, %v311_v63 }
  0xec   :  { %v285_v48 = vadd.f32 0.2548296, %v277_v31  ;;  %v270_v49 = vadd.f32 -0.28449672, %v262_v33  ;;  %v256_v30 = vadd.f32 1.4214138, %v248_v8 }
  0xed   :  { %v283_v51 = vadd.f32 0.2548296, %v275_v42  ;;  %v268_v53 = vadd.f32 -0.28449672, %v260_v62  ;;  %v306_v31 = vsub.f32 0.0, %v950_v60  ;;  %v247_v42 = vmul.f32 %v975_v58, %v239_v19 }
  0xee   :  { %v278_v54 = vmul.f32 %v939_v26, %v270_v49  ;;  %v293_v1 = vmul.f32 %v916_v11, %v285_v48  ;;  %v985_v11 = vpop.eup %633  ;;  %v264_v48 = vmul.f32 %v969_v47, %v256_v30 }
  0xef   :  { %v291_v59 = vmul.f32 %v925_v18, %v283_v51  ;;  %v276_v52 = vmul.f32 %v942_v50, %v268_v53  ;;  %v209_v18 = vadd.f32 1.0, %v201_v4  ;;  %v255_v49 = vadd.f32 1.4214138, %v247_v42  ;;  %v636_v51 = vpop.eup %635 }
  0xf0   :  { %v286_v2 = vadd.f32 0.2548296, %v278_v54  ;;  %v333_v33 = vmul.f32 %v630_v5, %v293_v1  ;;  %v272_v12 = vadd.f32 -0.28449672, %v264_v48  ;;  %v314_v54 = vmul.f32 %v306_v31, %v950_v60 }
  0xf1   :  { %v331_v7 = vmul.f32 %v628_v0, %v291_v59  ;;  %v284_v10 = vadd.f32 0.2548296, %v276_v52  ;;  %637 = vrcp.f32 %v209_v18 }
  0xf2   :  { %v294_v38 = vmul.f32 %v939_v26, %v286_v2  ;;  %639 = vpow2.f32 %v325_v16  ;;  %v341_v55 = vsub.f32 1.0, %v333_v33  ;;  %v263_v26 = vmul.f32 %v975_v58, %v255_v49 }
  0xf3   :  { %v292_v24 = vmul.f32 %v942_v50, %v284_v10  ;;  %v339_v62 = vsub.f32 1.0, %v331_v7  ;;  %v234_v50 = vmul.f32 1.0614054, %v985_v11  ;;  %641 = vpow2.f32 %v323_v36 }
  0xf4   :  { %v334_v59 = vmul.f32 %v636_v51, %v294_v38  ;;  %v280_v63 = vmul.f32 %v969_v47, %v272_v12  ;;  %v271_v1 = vadd.f32 -0.28449672, %v263_v26  ;;  %v305_v2 = vsub.f32 0.0, %v193_v57 }
  0xf5   :  { %v332_v45 = vmul.f32 %v632_v21, %v292_v24  ;;  %v355_v52 = vsub.f32 0.0, %v339_v62  ;;  %v242_v0 = vadd.f32 -1.4531521, %v234_v50  ;;  %v329_v7 = vmul.f32 1.442695, %v314_v54 }
  0xf6   :  { %v288_v4 = vadd.f32 0.2548296, %v280_v63  ;;  %v279_v60 = vmul.f32 %v975_v58, %v271_v1  ;;  %v357_v8 = vsub.f32 0.0, %v341_v55  ;;  %v342_v16 = vsub.f32 1.0, %v334_v59  ;;  %v1012_v1 = vpop.xlane.xlu0 %413 }
  0xf7   :  { %v340_v53 = vsub.f32 1.0, %v332_v45  ;;  %v250_v10 = vmul.f32 %v985_v11, %v242_v0  ;;  %v363_v5 = vsel %vm347_vm3, %v355_v52, %v339_v62  ;;  %v313_v24 = vmul.f32 %v305_v2, %v193_v57 }
  0xf8   :  { %v296_v19 = vmul.f32 %v969_v47, %v288_v4  ;;  %v287_v37 = vadd.f32 0.2548296, %v279_v60  ;;  %v171_v36 = vmul.f32 0.5, %v858_v13  ;;  %643 = vpow2.f32 %v329_v7  ;;  %v1018_v7 = vpop.xlane.xlu1 %416 }
  0xf9   :  { %v356_v43 = vsub.f32 0.0, %v340_v53  ;;  %v258_v30 = vadd.f32 1.4214138, %v250_v10  ;;  %v371_v33 = vadd.f32 1.0, %v363_v5  ;;  %v172_v38 = vmul.f32 0.5, %v874_v27 }
  0xfa   :  { %v295_v42 = vmul.f32 %v975_v58, %v287_v37  ;;  %v365_v45 = vsel %vm349_vm4, %v357_v8, %v341_v55  ;;  %v358_v48 = vsub.f32 0.0, %v342_v16  ;;  %v327_v51 = vmul.f32 1.442695, %v313_v24 }
  0xfb   :  { %v364_v3 = vsel %vm348_vm2, %v356_v43, %v340_v53  ;;  %v999_v18 = vpop.eup %637  ;;  %v266_v47 = vmul.f32 %v985_v11, %v258_v30  ;;  %v373_v12 = vadd.f32 1.0, %v365_v45  ;;  %v379_v54 = vmul.f32 %v371_v33, %v171_v36 }
  0xfc   :  { %v372_v21 = vadd.f32 1.0, %v364_v3  ;;  %v233_v20 = vmul.f32 1.0614054, %v999_v18  ;;  %v640_v31 = vpop.eup %639  ;;  %v173_v59 = vmul.f32 0.5, %v853_v9  ;;  %v366_v26 = vsel %vm350_vm5, %v358_v48, %v342_v16 }
  0xfd   :  { %v642_v62 = vpop.eup %641  ;;  %v336_v57 = vmul.f32 %v640_v31, %v296_v19  ;;  %v274_v13 = vadd.f32 -0.28449672, %v266_v47  ;;  %645 = vpow2.f32 %v327_v51  ;;  %v387_v3 = vsel %vm68_vm0, %v379_v54, 0.0 }
  0xfe   :  { %v241_v49 = vadd.f32 -1.4531521, %v233_v20  ;;  %v380_v50 = vmul.f32 %v372_v21, %v172_v38  ;;  %v335_v17 = vmul.f32 %v642_v62, %v295_v42  ;;  %v381_v2 = vmul.f32 %v373_v12, %v173_v59  ;;  %v1027_v42 = vpop.xlane.xlu1 %422 }
  0xff   :  { %v282_v58 = vmul.f32 %v985_v11, %v274_v13  ;;  %v344_v55 = vsub.f32 1.0, %v336_v57  ;;  %v374_v4 = vadd.f32 1.0, %v366_v26  ;;  %v174_v19 = vmul.f32 0.5, %v870_v25 }
 0x100   :  { %v249_v53 = vmul.f32 %v999_v18, %v241_v49  ;;  %v343_v27 = vsub.f32 1.0, %v335_v17  ;;  %v388_v43 = vsel %vm68_vm0, %v380_v50, 0.0  ;;  %v390_v37 = vsel %vm68_vm0, %v381_v2, 0.0 }
 0x101   :  { %v290_v0 = vadd.f32 0.2548296, %v282_v58  ;;  %v389_v10 = vadd.f32 %v388_v43, %v387_v3  ;;  %v360_v8 = vsub.f32 0.0, %v344_v55  ;;  %v382_v24 = vmul.f32 %v374_v4, %v174_v19 }
 0x102   :  { %v257_v52 = vadd.f32 1.4214138, %v249_v53  ;;  %v359_v63 = vsub.f32 0.0, %v343_v27  ;;  %v644_v60 = vpop.eup %643  ;;  %v175_v38 = vmul.f32 0.5, %v910_v6  ;;  %v176_v50 = vmul.f32 0.5, %v901_v61  ;;  %v429_v53 = vpop.xlane.xlu1 %428 }
 0x103   :  { %v298_v9 = vmul.f32 %v985_v11, %v290_v0  ;;  %v1024_v11 = vpop.xlane.xlu0 %419  ;;  %v391_v20 = vadd.f32 %v390_v37, %v389_v10  ;;  %v368_v31 = vsel %vm352_vm7, %v360_v8, %v344_v55  ;;  %v392_v62 = vsel %vm68_vm0, %v382_v24, 0.0 }
 0x104   :  { %v265_v32 = vmul.f32 %v999_v18, %v257_v52  ;;  %v367_v5 = vsel %vm351_vm6, %v359_v63, %v343_v27  ;;  %v376_v45 = vadd.f32 1.0, %v368_v31  ;;  %647 = vrsqrt.f32 %v1018_v7 }
 0x105   :  { %v338_v21 = vmul.f32 %v644_v60, %v298_v9  ;;  %v375_v30 = vadd.f32 1.0, %v367_v5  ;;  %v393_v49 = vadd.f32 %v392_v62, %v391_v20  ;;  %649 = vrsqrt.f32 %v1012_v1 }
 0x106   :  { %v273_v16 = vadd.f32 -0.28449672, %v265_v32  ;;  %v384_v13 = vmul.f32 %v376_v45, %v176_v50  ;;  %651 = vrsqrt.f32 %v1027_v42  ;;  %v471_v27 = vunpack.c.l.s4 %v739_v44  ;;  %v435_v2 = vpop.xlane.xlu1 %434 }
 0x107   :  { %v346_v36 = vsub.f32 1.0, %v338_v21  ;;  %v646_v56 = vpop.eup %645  ;;  %v383_v48 = vmul.f32 %v375_v30, %v175_v38  ;;  %v1033_v17 = vpop.xlane.xlu0 %425  ;;  %653 = vrsqrt.f32 %v1024_v11  ;;  %v178_v58 = vmul.f32 0.5, %v922_v15 }
 0x108   :  { %v281_v14 = vmul.f32 %v999_v18, %v273_v16  ;;  %v473_v26 = vlaneseq  ;;  %655 = vrsqrt.f32 %v429_v53  ;;  %v177_v55 = vmul.f32 0.5, %v958_v39 }
 0x109   :  { %v362_v47 = vsub.f32 0.0, %v346_v36  ;;  %v396_v43 = vsel %vm68_vm0, %v384_v13, 0.0  ;;  %657 = vrsqrt.f32 %v1033_v17  ;;  %v472_v3 = vunpack.c.0.s8 %v471_v27 }
 0x10a   :  { %v289_v33 = vadd.f32 0.2548296, %v281_v14  ;;  %v474_v4 = vshrl.u32 %v473_v26, 7  ;;  %vm437_vm10 = vcmp.gt.f32.partialorder %v1018_v7, 1e-24 }
 0x10b   :  { %v370_v6 = vsel %vm354_vm8, %v362_v47, %v346_v36  ;;  %v432_v63 = vpop.xlane.xlu0 %431  ;;  %vm436_vm11 = vcmp.gt.f32.partialorder %v1012_v1, 1e-24  ;;  %vm439_vm12 = vcmp.gt.f32.partialorder %v1027_v42, 1e-24  ;;  %vm438_vm13 = vcmp.gt.f32.partialorder %v1024_v11, 1e-24 }
 0x10c   :  { %v297_v25 = vmul.f32 %v999_v18, %v289_v33  ;;  %v394_v18 = vsel %vm68_vm0, %v383_v48, 0.0  ;;  %v378_v61 = vadd.f32 1.0, %v370_v6  ;;  %659 = vrsqrt.f32 %v432_v63 }
 0x10d   :  { %v395_v54 = vadd.f32 %v394_v18, %v393_v49  ;;  %661 = vrsqrt.f32 %v435_v2  ;;  %v475_v16 = vsub.s32 %v472_v3, %v474_v4  ;;  %vm441_vm14 = vcmp.gt.f32.partialorder %v429_v53, 1e-24 }
 0x10e   :  { %v337_v57 = vmul.f32 %v646_v56, %v297_v25  ;;  %v386_v32 = vmul.f32 %v378_v61, %v178_v58  ;;  %v648_v9 = vpop.eup %647  ;;  %v520_v30 = vsub.s32 0, %v474_v4  ;;  %vm440_vm15 = vcmp.gt.f32.partialorder %v1033_v17, 1e-24 }
 0x10f   :  { %v397_v0 = vadd.f32 %v396_v43, %v395_v54  ;;  %v650_v10 = vpop.eup %649  ;;  %v453_v37 = vsel %vm437_vm10, %v648_v9, 1e+12  ;;  %vm442_vm1 = vcmp.gt.f32.partialorder %v432_v63, 1e-24  ;;  %vm443_vm2 = vcmp.gt.f32.partialorder %v435_v2, 1e-24 }
 0x110   :  { %v345_v51 = vsub.f32 1.0, %v337_v57  ;;  %v400_v39 = vsel %vm68_vm0, %v386_v32, 0.0  ;;  %v652_v8 = vpop.eup %651  ;;  %v452_v36 = vsel %vm436_vm11, %v650_v10, 1e+12  ;;  %v461_v1 = vmul.f32 %v453_v37, %v797_v22 }
 0x111   :  { %v654_v19 = vpop.eup %653  ;;  %v455_v20 = vsel %vm439_vm12, %v652_v8, 1e+12  ;;  %v460_v62 = vmul.f32 %v452_v36, %v799_v23 }
 0x112   :  { %v361_v12 = vsub.f32 0.0, %v345_v51  ;;  %v656_v21 = vpop.eup %655  ;;  %v454_v31 = vsel %vm438_vm13, %v654_v19, 1e+12  ;;  %v463_v45 = vmul.f32 %v455_v20, %v807_v28 }
 0x113   :  { %v658_v24 = vpop.eup %657  ;;  %v457_v38 = vsel %vm441_vm14, %v656_v21, 1e+12  ;;  %v462_v48 = vmul.f32 %v454_v31, %v809_v29 }
 0x114   :  { %v369_v59 = vsel %vm353_vm9, %v361_v12, %v345_v51  ;;  %v456_v56 = vsel %vm440_vm15, %v658_v24, 1e+12  ;;  %v465_v22 = vmul.f32 %v457_v38, %v817_v34 }
 0x115   :  { %v377_v52 = vadd.f32 1.0, %v369_v59  ;;  %v464_v13 = vmul.f32 %v456_v56, %v819_v35 }
 0x116   :  { %v660_v42 = vpop.eup %659 }
 0x117   :  { %v385_v46 = vmul.f32 %v377_v52, %v177_v55  ;;  %v662_v57 = vpop.eup %661  ;;  %v458_v18 = vsel %vm442_vm1, %v660_v42, 1e+12 }
 0x118   :  { %v459_v29 = vsel %vm443_vm2, %v662_v57, 1e+12  ;;  %v466_v34 = vmul.f32 %v458_v18, %v829_v41 }
 0x119   :  { %v398_v15 = vsel %vm68_vm0, %v385_v46, 0.0  ;;  %v467_v46 = vmul.f32 %v459_v29, %v827_v40 }
 0x11a   :  { %v399_v60 = vadd.f32 %v398_v15, %v397_v0 }
 0x11c   :  { %v401_v5 = vadd.f32 %v400_v39, %v399_v60 }
 0x11e   :  { %v403_v14 = vmul.f32 0.125, %v401_v5 }
 0x120   :  { %v476_v7 = vrot.slane %v403_v14, %v475_v16  ;;  %v469_v33 = vcombine.high %v403_v14, %v403_v14 }
 0x122   :  { %v484_v25 = vcombine.high %v476_v7, %v476_v7  ;;  %v492_v11 = vrot.slane %v476_v7, %v475_v16  ;;  %v483_v47 = vrot.slane %v469_v33, %v475_v16 }
 0x124   :  { %v506_v49 = vrot.slane %v484_v25, %v475_v16  ;;  %v521_v50 = vrot.slane %v492_v11, %v520_v30  ;;  %v514_v17 = vcombine.high %v492_v11, %v492_v11  ;;  %v485_v51 = vcombine.high %v483_v47, %v483_v47 }
 0x125   :  { %v499_v6 = vrot.slane %v483_v47, %v475_v16 }
 0x126   :  { %v525_v53 = vrot.slane %v506_v49, %v520_v30  ;;  %v558_v12 = vmul.f32 %v521_v50, %v460_v62  ;;  %v516_v23 = vcombine.high %v506_v49, %v506_v49  ;;  %v529_v54 = vrot.slane %v514_v17, %v520_v30 }
 0x127   :  { %v513_v28 = vrot.slane %v485_v51, %v475_v16  ;;  %v537_v61 = vrot.slane %v499_v6, %v520_v30  ;;  %v515_v44 = vcombine.high %v499_v6, %v499_v6 }
 0x128   :  { %v559_v27 = vmul.f32 %v525_v53, %v461_v1  ;;  %566 = vst.msk [vmem:[#allocation7] sm:$0xff] %vm68_vm0, %v558_v12  ;;  %v533_v58 = vrot.slane %v516_v23, %v520_v30  ;;  %v560_v59 = vmul.f32 %v529_v54, %v462_v48 }
 0x129   :  { %v541_v26 = vrot.slane %v513_v28, %v520_v30  ;;  %v562_v35 = vmul.f32 %v537_v61, %v464_v13  ;;  %v517_v55 = vcombine.high %v513_v28, %v513_v28  ;;  %v545_v52 = vrot.slane %v515_v44, %v520_v30 }
 0x12a   :  { %567 = vst.msk [vmem:[#allocation7 + $0x8] sm:$0xff] %vm68_vm0, %v559_v27  ;;  %v561_v43 = vmul.f32 %v533_v58, %v463_v45  ;;  %568 = vst.msk [vmem:[#allocation7 + $0x10] sm:$0xff] %vm68_vm0, %v560_v59 }
 0x12b   :  { %v563_v63 = vmul.f32 %v541_v26, %v465_v22  ;;  %570 = vst.msk [vmem:[#allocation7 + $0x20] sm:$0xff] %vm68_vm0, %v562_v35  ;;  %v549_v0 = vrot.slane %v517_v55, %v520_v30  ;;  %v564_v32 = vmul.f32 %v545_v52, %v466_v34 }
 0x12c   :  { %569 = vst.msk [vmem:[#allocation7 + $0x18] sm:$0xff] %vm68_vm0, %v561_v43 }
 0x12d   :  { %571 = vst.msk [vmem:[#allocation7 + $0x28] sm:$0xff] %vm68_vm0, %v563_v63  ;;  %v565_v41 = vmul.f32 %v549_v0, %v467_v46  ;;  %572 = vst.msk [vmem:[#allocation7 + $0x30] sm:$0xff] %vm68_vm0, %v564_v32 }
 0x12f   :  { %573 = vst.msk [vmem:[#allocation7 + $0x38] sm:$0xff] %vm68_vm0, %v565_v41 }
 0x130   :  { %718 = shalt.err (!%p715_p6)
}
 0x131   :  { %s719_s15 = scalar_lea.hbm %s1088_s3, 1024 }
 0x132   :  { %p720_p7 = scmp.ne.s32.totalorder %s1088_s3, %s719_s15  ;;  %p723_p8 = scmp.lt.u32.totalorder %s719_s15, %s1088_s3 }
 0x134   :  { %p725_p9 = pnand %p723_p8, %p720_p7 }
 0x136   :  { %728 = shalt.err (!%p725_p9)
}
 0x137   :  { %585 = dma.vmem_to_hbm [thread:$0]  %s580_s11, 1024, %s1088_s3, [#allocation4], %s736_s22, %s736_s22, %s737_s23  }
 0x138   :  { %733 = dma.done.wait [#allocation4], 1024  }
 0x139   :  { %734 = vsyncadd [#allocation4], 4294966272 }
 0x13a   :  { %589 = vsyncpa [#allocation3], 1 }
 0x13b   :  { %590 = vsyncpa [#allocation6], 1 }
 0x13c   :  { %591 = vsyncpa [#allocation4], 1 }

</bundles_post_ra>
